<compile_context>
chip_gen: v6e
topology: v6e:2x2x1
jax: 0.10.0
libtpu: 0.0.40
codegen_flags: <defaults>
</compile_context>

<pallas_src>
import jax
import jax.numpy as jnp
from jax.experimental import pallas as pl
from jax.experimental.pallas import tpu as pltpu


# ---------------------------------------------------------------------------
# Kernel bodies
# ---------------------------------------------------------------------------

def _mlp_body(x, w1_ref, b1_ref, w2_ref, b2_ref, out_dtype):
    """Linear -> ReLU -> Linear on an (tm, D) f32 row slab.

    Weights are bf16 (MXU operands); accumulation and the bias/ReLU epilogue
    are f32 (friendly to v5e's f32-only VPU as well as v6e/v7x).
    """
    h = jnp.dot(x.astype(w1_ref.dtype), w1_ref[...],
                preferred_element_type=jnp.float32)
    h = jnp.maximum(h + b1_ref[...], 0.0)
    out = jnp.dot(h.astype(w2_ref.dtype), w2_ref[...],
                  preferred_element_type=jnp.float32)
    return (out + b2_ref[...]).astype(out_dtype)


def _triplet_kernel(x1_ref, x2_ref, x3_ref, w1_ref, b1_ref, w2_ref, b2_ref,
                    o1_ref, o2_ref, o3_ref):
    # Per-input processing (no concatenate): low vreg pressure, no VMEM copy
    # slab; weights are read once per tile and reused for all three members.
    o1_ref[...] = _mlp_body(x1_ref[...], w1_ref, b1_ref, w2_ref, b2_ref,
                            o1_ref.dtype)
    o2_ref[...] = _mlp_body(x2_ref[...], w1_ref, b1_ref, w2_ref, b2_ref,
                            o2_ref.dtype)
    o3_ref[...] = _mlp_body(x3_ref[...], w1_ref, b1_ref, w2_ref, b2_ref,
                            o3_ref.dtype)


def _single_kernel(x_ref, w1_ref, b1_ref, w2_ref, b2_ref, o_ref):
    o_ref[...] = _mlp_body(x_ref[...], w1_ref, b1_ref, w2_ref, b2_ref,
                           o_ref.dtype)


# ---------------------------------------------------------------------------
# pallas_call wrappers
# ---------------------------------------------------------------------------

# 1024-row cap keeps double-buffered 3-in + 3-out f32 tiles (~6.3 MiB at
# D=E=128) under v5e's 16 MiB default scoped-VMEM limit; raise it together
# with pltpu.CompilerParams(vmem_limit_bytes=...) if needed.
_ROW_TILE_CAP = 1024


def _row_tile(batch, cap=_ROW_TILE_CAP):
    """Largest multiple-of-8 row tile <= cap that still yields >= 2 grid
    steps (so v7x can shard row tiles across its 2 TensorCores)."""
    if batch <= 8:
        return batch                      # full-extent block, (8,128) rule ok
    half = -(-batch // 2)                 # ceil(B / 2)
    half = -(-half // 8) * 8              # round up to a multiple of 8
    return max(8, min(cap, half))


def _weight_specs(d_in, hidden, d_out):
    return [
        pl.BlockSpec((d_in, hidden), lambda i: (0, 0)),
        pl.BlockSpec((1, hidden), lambda i: (0, 0)),
        pl.BlockSpec((hidden, d_out), lambda i: (0, 0)),
        pl.BlockSpec((1, d_out), lambda i: (0, 0)),
    ]


def triplet_forward(x1, x2, x3, params):
    """(B, D) x3 -> three (B, E) embeddings with one pallas_call."""
    w1, b1, w2, b2 = params
    B, D = x1.shape
    H = w1.shape[1]
    E = w2.shape[1]
    tm = _row_tile(B)
    grid = (pl.cdiv(B, tm),)              # short last tile is masked; rows
                                          # are independent so this is safe.

    f32_bytes = 4
    w_bytes = jnp.dtype(w1.dtype).itemsize
    cost = pl.CostEstimate(
        flops=2 * 3 * B * (D * H + H * E),
        transcendentals=0,
        bytes_accessed=(3 * B * D + 3 * B * E + H + E) * f32_bytes
                       + (D * H + H * E) * w_bytes,
    )

    return pl.pallas_call(
        _triplet_kernel,
        out_shape=tuple(jax.ShapeDtypeStruct((B, E), jnp.float32)
                        for _ in range(3)),
        grid=grid,
        in_specs=[pl.BlockSpec((tm, D), lambda i: (i, 0)) for _ in range(3)]
                 + _weight_specs(D, H, E),
        out_specs=tuple(pl.BlockSpec((tm, E), lambda i: (i, 0))
                        for _ in range(3)),
        compiler_params=pltpu.CompilerParams(
            dimension_semantics=("parallel",)),
        cost_estimate=cost,
    )(x1, x2, x3, w1, b1, w2, b2)


def embed_forward(x, params):
    """(B, D) -> (B, E) embedding (get_embedding path)."""
    w1, b1, w2, b2 = params
    B, D = x.shape
    H = w1.shape[1]
    E = w2.shape[1]
    tm = _row_tile(B)
    grid = (pl.cdiv(B, tm),)

    f32_bytes = 4
    w_bytes = jnp.dtype(w1.dtype).itemsize
    cost = pl.CostEstimate(
        flops=2 * B * (D * H + H * E),
        transcendentals=0,
        bytes_accessed=(B * D + B * E + H + E) * f32_bytes
                       + (D * H + H * E) * w_bytes,
    )

    return pl.pallas_call(
        _single_kernel,
        out_shape=jax.ShapeDtypeStruct((B, E), jnp.float32),
        grid=grid,
        in_specs=[pl.BlockSpec((tm, D), lambda i: (i, 0))]
                 + _weight_specs(D, H, E),
        out_specs=pl.BlockSpec((tm, E), lambda i: (i, 0)),
        compiler_params=pltpu.CompilerParams(
            dimension_semantics=("parallel",)),
        cost_estimate=cost,
    )(x, w1, b1, w2, b2)


# ---------------------------------------------------------------------------
# Module wrappers (mirror the PyTorch structure)
# ---------------------------------------------------------------------------

class EmbeddingNet:
    """Concrete embedding net: Linear -> ReLU -> Linear (Pallas-backed)."""

    def __init__(self, d_in, hidden, d_out, key):
        k1, k2, k3, k4 = jax.random.split(key, 4)
        lim1 = 1.0 / jnp.sqrt(d_in)
        lim2 = 1.0 / jnp.sqrt(hidden)
        # Weights in bf16 (MXU operands), biases in f32 (f32 epilogue).
        self.w1 = jax.random.uniform(k1, (d_in, hidden), jnp.float32,
                                     -lim1, lim1).astype(jnp.bfloat16)
        self.b1 = jax.random.uniform(k2, (1, hidden), jnp.float32, -lim1, lim1)
        self.w2 = jax.random.uniform(k3, (hidden, d_out), jnp.float32,
                                     -lim2, lim2).astype(jnp.bfloat16)
        self.b2 = jax.random.uniform(k4, (1, d_out), jnp.float32, -lim2, lim2)

    @property
    def params(self):
        return (self.w1, self.b1, self.w2, self.b2)

    def __call__(self, x):
        return embed_forward(x, self.params)


class TripletNet:
    def __init__(self, embedding_net):
        self.embedding_net = embedding_net

    def forward(self, x1, x2, x3):
        # One pallas_call; each grid step processes a row tile of all three
        # inputs with resident weights — no wrapper-side stack/copy.
        return triplet_forward(x1, x2, x3, self.embedding_net.params)

    def __call__(self, x1, x2, x3):
        return self.forward(x1, x2, x3)

    def get_embedding(self, x):
        return self.embedding_net(x)


# ---------------------------------------------------------------------------
# Pure-JAX reference (mirrors the kernel's bf16 operand rounding exactly)
# ---------------------------------------------------------------------------

def _reference_embed(x, params):
    w1, b1, w2, b2 = params
    xb = x.astype(jnp.bfloat16).astype(jnp.float32)
    h = xb @ w1.astype(jnp.float32) + b1
    h = jnp.maximum(h, 0.0)
    hb = h.astype(jnp.bfloat16).astype(jnp.float32)
    return hb @ w2.astype(jnp.float32) + b2


if __name__ == "__main__":
    # Lane-dense feature dims (multiples of 128); B=16 with tm=8 gives a
    # 2-step "parallel" grid (exercises the v7x 2-TC sharding path).
    B, D_IN, HIDDEN, E = 16, 128, 128, 128

    key = jax.random.PRNGKey(0)
    k_net, k1, k2, k3 = jax.random.split(key, 4)

    embedding_net = EmbeddingNet(D_IN, HIDDEN, E, k_net)
    model = TripletNet(embedding_net)

    x1 = jax.random.normal(k1, (B, D_IN), jnp.float32)
    x2 = jax.random.normal(k2, (B, D_IN), jnp.float32)
    x3 = jax.random.normal(k3, (B, D_IN), jnp.float32)

    o1, o2, o3 = model(x1, x2, x3)
    jax.block_until_ready((o1, o2, o3))

    r1 = _reference_embed(x1, embedding_net.params)
    r2 = _reference_embed(x2, embedding_net.params)
    r3 = _reference_embed(x3, embedding_net.params)

    assert o1.shape == (B, E) and o2.shape == (B, E) and o3.shape == (B, E)
    assert jnp.allclose(o1, r1, atol=1e-3, rtol=1e-3)
    assert jnp.allclose(o2, r2, atol=1e-3, rtol=1e-3)
    assert jnp.allclose(o3, r3, atol=1e-3, rtol=1e-3)

    # get_embedding path (single input).
    e1 = model.get_embedding(x1)
    jax.block_until_ready(e1)
    assert e1.shape == (B, E)
    assert jnp.allclose(e1, r1, atol=1e-3, rtol=1e-3)

    print("KERNEL_OK")
</pallas_src>

<mosaic_0001>
module attributes {stable_mosaic.version = 11 : i64} {
  func.func @_triplet_kernel(%arg0: i32, %arg1: memref<8x128xf32, #tpu.memory_space<vmem>>, %arg2: memref<8x128xf32, #tpu.memory_space<vmem>>, %arg3: memref<8x128xf32, #tpu.memory_space<vmem>>, %arg4: memref<128x128xbf16, #tpu.memory_space<vmem>>, %arg5: memref<1x128xf32, #tpu.memory_space<vmem>>, %arg6: memref<128x128xbf16, #tpu.memory_space<vmem>>, %arg7: memref<1x128xf32, #tpu.memory_space<vmem>>, %arg8: memref<8x128xf32, #tpu.memory_space<vmem>>, %arg9: memref<8x128xf32, #tpu.memory_space<vmem>>, %arg10: memref<8x128xf32, #tpu.memory_space<vmem>>) attributes {dimension_semantics = [#tpu.dimension_semantics<parallel>], iteration_bounds = array<i64: 2>, scalar_prefetch = 0 : i64, scratch_operands = 0 : i64, tpu.core_type = #tpu.core_type<tc>, window_params = [{transform_indices = @transform_0, window_bounds = array<i64: 8, 128>}, {transform_indices = @transform_1, window_bounds = array<i64: 8, 128>}, {transform_indices = @transform_2, window_bounds = array<i64: 8, 128>}, {pipeline_mode = #tpu.pipeline_mode<synchronous>, transform_indices = @transform_3, window_bounds = array<i64: 128, 128>}, {pipeline_mode = #tpu.pipeline_mode<synchronous>, transform_indices = @transform_4, window_bounds = array<i64: 1, 128>}, {pipeline_mode = #tpu.pipeline_mode<synchronous>, transform_indices = @transform_5, window_bounds = array<i64: 128, 128>}, {pipeline_mode = #tpu.pipeline_mode<synchronous>, transform_indices = @transform_6, window_bounds = array<i64: 1, 128>}, {transform_indices = @transform_7, window_bounds = array<i64: 8, 128>}, {transform_indices = @transform_8, window_bounds = array<i64: 8, 128>}, {transform_indices = @transform_9, window_bounds = array<i64: 8, 128>}]} {
    %c0 = arith.constant 0 : index
    %c0_0 = arith.constant 0 : index
    %0 = vector.load %arg1[%c0, %c0_0] : memref<8x128xf32, #tpu.memory_space<vmem>>, vector<8x128xf32>
    %1 = arith.truncf %0 : vector<8x128xf32> to vector<8x128xbf16>
    %c0_1 = arith.constant 0 : index
    %c0_2 = arith.constant 0 : index
    %2 = vector.load %arg4[%c0_1, %c0_2] : memref<128x128xbf16, #tpu.memory_space<vmem>>, vector<128x128xbf16>
    %cst = arith.constant dense<0.000000e+00> : vector<8x128xf32>
    %3 = tpu.matmul %1, %2, %cst {dimension_numbers = #tpu.dot_dimension_numbers<[1], [0], [0], [1], [0, 0, 1, 1], [], []>} : vector<8x128xbf16>, vector<128x128xbf16>, vector<8x128xf32> -> vector<8x128xf32>
    %c0_3 = arith.constant 0 : index
    %c0_4 = arith.constant 0 : index
    %4 = vector.load %arg5[%c0_3, %c0_4] : memref<1x128xf32, #tpu.memory_space<vmem>>, vector<1x128xf32>
    %5 = vector.broadcast %4 : vector<1x128xf32> to vector<8x128xf32>
    %6 = arith.addf %3, %5 : vector<8x128xf32>
    %cst_5 = arith.constant 0.000000e+00 : f32
    %7 = vector.broadcast %cst_5 : f32 to vector<8x128xf32>
    %8 = arith.maximumf %6, %7 : vector<8x128xf32>
    %9 = arith.truncf %8 : vector<8x128xf32> to vector<8x128xbf16>
    %c0_6 = arith.constant 0 : index
    %c0_7 = arith.constant 0 : index
    %10 = vector.load %arg6[%c0_6, %c0_7] : memref<128x128xbf16, #tpu.memory_space<vmem>>, vector<128x128xbf16>
    %cst_8 = arith.constant dense<0.000000e+00> : vector<8x128xf32>
    %11 = tpu.matmul %9, %10, %cst_8 {dimension_numbers = #tpu.dot_dimension_numbers<[1], [0], [0], [1], [0, 0, 1, 1], [], []>} : vector<8x128xbf16>, vector<128x128xbf16>, vector<8x128xf32> -> vector<8x128xf32>
    %c0_9 = arith.constant 0 : index
    %c0_10 = arith.constant 0 : index
    %12 = vector.load %arg7[%c0_9, %c0_10] : memref<1x128xf32, #tpu.memory_space<vmem>>, vector<1x128xf32>
    %13 = vector.broadcast %12 : vector<1x128xf32> to vector<8x128xf32>
    %14 = arith.addf %11, %13 : vector<8x128xf32>
    %c0_11 = arith.constant 0 : index
    %c0_12 = arith.constant 0 : index
    %15 = vector.load %arg8[%c0_11, %c0_12] : memref<8x128xf32, #tpu.memory_space<vmem>>, vector<8x128xf32>
    tpu.vector_store %arg8[%c0_11, %c0_12], %14 {strides = array<i32>} : memref<8x128xf32, #tpu.memory_space<vmem>>, vector<8x128xf32>,
    %c0_13 = arith.constant 0 : index
    %c0_14 = arith.constant 0 : index
    %16 = vector.load %arg2[%c0_13, %c0_14] : memref<8x128xf32, #tpu.memory_space<vmem>>, vector<8x128xf32>
    %17 = arith.truncf %16 : vector<8x128xf32> to vector<8x128xbf16>
    %c0_15 = arith.constant 0 : index
    %c0_16 = arith.constant 0 : index
    %18 = vector.load %arg4[%c0_15, %c0_16] : memref<128x128xbf16, #tpu.memory_space<vmem>>, vector<128x128xbf16>
    %cst_17 = arith.constant dense<0.000000e+00> : vector<8x128xf32>
    %19 = tpu.matmul %17, %18, %cst_17 {dimension_numbers = #tpu.dot_dimension_numbers<[1], [0], [0], [1], [0, 0, 1, 1], [], []>} : vector<8x128xbf16>, vector<128x128xbf16>, vector<8x128xf32> -> vector<8x128xf32>
    %c0_18 = arith.constant 0 : index
    %c0_19 = arith.constant 0 : index
    %20 = vector.load %arg5[%c0_18, %c0_19] : memref<1x128xf32, #tpu.memory_space<vmem>>, vector<1x128xf32>
    %21 = vector.broadcast %20 : vector<1x128xf32> to vector<8x128xf32>
    %22 = arith.addf %19, %21 : vector<8x128xf32>
    %cst_20 = arith.constant 0.000000e+00 : f32
    %23 = vector.broadcast %cst_20 : f32 to vector<8x128xf32>
    %24 = arith.maximumf %22, %23 : vector<8x128xf32>
    %25 = arith.truncf %24 : vector<8x128xf32> to vector<8x128xbf16>
    %c0_21 = arith.constant 0 : index
    %c0_22 = arith.constant 0 : index
    %26 = vector.load %arg6[%c0_21, %c0_22] : memref<128x128xbf16, #tpu.memory_space<vmem>>, vector<128x128xbf16>
    %cst_23 = arith.constant dense<0.000000e+00> : vector<8x128xf32>
    %27 = tpu.matmul %25, %26, %cst_23 {dimension_numbers = #tpu.dot_dimension_numbers<[1], [0], [0], [1], [0, 0, 1, 1], [], []>} : vector<8x128xbf16>, vector<128x128xbf16>, vector<8x128xf32> -> vector<8x128xf32>
    %c0_24 = arith.constant 0 : index
    %c0_25 = arith.constant 0 : index
    %28 = vector.load %arg7[%c0_24, %c0_25] : memref<1x128xf32, #tpu.memory_space<vmem>>, vector<1x128xf32>
    %29 = vector.broadcast %28 : vector<1x128xf32> to vector<8x128xf32>
    %30 = arith.addf %27, %29 : vector<8x128xf32>
    %c0_26 = arith.constant 0 : index
    %c0_27 = arith.constant 0 : index
    %31 = vector.load %arg9[%c0_26, %c0_27] : memref<8x128xf32, #tpu.memory_space<vmem>>, vector<8x128xf32>
    tpu.vector_store %arg9[%c0_26, %c0_27], %30 {strides = array<i32>} : memref<8x128xf32, #tpu.memory_space<vmem>>, vector<8x128xf32>,
    %c0_28 = arith.constant 0 : index
    %c0_29 = arith.constant 0 : index
    %32 = vector.load %arg3[%c0_28, %c0_29] : memref<8x128xf32, #tpu.memory_space<vmem>>, vector<8x128xf32>
    %33 = arith.truncf %32 : vector<8x128xf32> to vector<8x128xbf16>
    %c0_30 = arith.constant 0 : index
    %c0_31 = arith.constant 0 : index
    %34 = vector.load %arg4[%c0_30, %c0_31] : memref<128x128xbf16, #tpu.memory_space<vmem>>, vector<128x128xbf16>
    %cst_32 = arith.constant dense<0.000000e+00> : vector<8x128xf32>
    %35 = tpu.matmul %33, %34, %cst_32 {dimension_numbers = #tpu.dot_dimension_numbers<[1], [0], [0], [1], [0, 0, 1, 1], [], []>} : vector<8x128xbf16>, vector<128x128xbf16>, vector<8x128xf32> -> vector<8x128xf32>
    %c0_33 = arith.constant 0 : index
    %c0_34 = arith.constant 0 : index
    %36 = vector.load %arg5[%c0_33, %c0_34] : memref<1x128xf32, #tpu.memory_space<vmem>>, vector<1x128xf32>
    %37 = vector.broadcast %36 : vector<1x128xf32> to vector<8x128xf32>
    %38 = arith.addf %35, %37 : vector<8x128xf32>
    %cst_35 = arith.constant 0.000000e+00 : f32
    %39 = vector.broadcast %cst_35 : f32 to vector<8x128xf32>
    %40 = arith.maximumf %38, %39 : vector<8x128xf32>
    %41 = arith.truncf %40 : vector<8x128xf32> to vector<8x128xbf16>
    %c0_36 = arith.constant 0 : index
    %c0_37 = arith.constant 0 : index
    %42 = vector.load %arg6[%c0_36, %c0_37] : memref<128x128xbf16, #tpu.memory_space<vmem>>, vector<128x128xbf16>
    %cst_38 = arith.constant dense<0.000000e+00> : vector<8x128xf32>
    %43 = tpu.matmul %41, %42, %cst_38 {dimension_numbers = #tpu.dot_dimension_numbers<[1], [0], [0], [1], [0, 0, 1, 1], [], []>} : vector<8x128xbf16>, vector<128x128xbf16>, vector<8x128xf32> -> vector<8x128xf32>
    %c0_39 = arith.constant 0 : index
    %c0_40 = arith.constant 0 : index
    %44 = vector.load %arg7[%c0_39, %c0_40] : memref<1x128xf32, #tpu.memory_space<vmem>>, vector<1x128xf32>
    %45 = vector.broadcast %44 : vector<1x128xf32> to vector<8x128xf32>
    %46 = arith.addf %43, %45 : vector<8x128xf32>
    %c0_41 = arith.constant 0 : index
    %c0_42 = arith.constant 0 : index
    %47 = vector.load %arg10[%c0_41, %c0_42] : memref<8x128xf32, #tpu.memory_space<vmem>>, vector<8x128xf32>
    tpu.vector_store %arg10[%c0_41, %c0_42], %46 {strides = array<i32>} : memref<8x128xf32, #tpu.memory_space<vmem>>, vector<8x128xf32>,
    return
  }
  func.func @transform_0(%arg0: i32) -> (i32, i32) {
    %c0_i32 = arith.constant 0 : i32
    %c0_i32_0 = arith.constant 0 : i32
    return %arg0, %c0_i32 : i32, i32
  }
  func.func @transform_1(%arg0: i32) -> (i32, i32) {
    %c0_i32 = arith.constant 0 : i32
    %c0_i32_0 = arith.constant 0 : i32
    return %arg0, %c0_i32 : i32, i32
  }
  func.func @transform_2(%arg0: i32) -> (i32, i32) {
    %c0_i32 = arith.constant 0 : i32
    %c0_i32_0 = arith.constant 0 : i32
    return %arg0, %c0_i32 : i32, i32
  }
  func.func @transform_3(%arg0: i32) -> (i32, i32) {
    %c0_i32 = arith.constant 0 : i32
    %c0_i32_0 = arith.constant 0 : i32
    %c0_i32_1 = arith.constant 0 : i32
    return %c0_i32, %c0_i32_0 : i32, i32
  }
  func.func @transform_4(%arg0: i32) -> (i32, i32) {
    %c0_i32 = arith.constant 0 : i32
    %c0_i32_0 = arith.constant 0 : i32
    %c0_i32_1 = arith.constant 0 : i32
    return %c0_i32, %c0_i32_0 : i32, i32
  }
  func.func @transform_5(%arg0: i32) -> (i32, i32) {
    %c0_i32 = arith.constant 0 : i32
    %c0_i32_0 = arith.constant 0 : i32
    %c0_i32_1 = arith.constant 0 : i32
    return %c0_i32, %c0_i32_0 : i32, i32
  }
  func.func @transform_6(%arg0: i32) -> (i32, i32) {
    %c0_i32 = arith.constant 0 : i32
    %c0_i32_0 = arith.constant 0 : i32
    %c0_i32_1 = arith.constant 0 : i32
    return %c0_i32, %c0_i32_0 : i32, i32
  }
  func.func @transform_7(%arg0: i32) -> (i32, i32) {
    %c0_i32 = arith.constant 0 : i32
    %c0_i32_0 = arith.constant 0 : i32
    return %arg0, %c0_i32 : i32, i32
  }
  func.func @transform_8(%arg0: i32) -> (i32, i32) {
    %c0_i32 = arith.constant 0 : i32
    %c0_i32_0 = arith.constant 0 : i32
    return %arg0, %c0_i32 : i32, i32
  }
  func.func @transform_9(%arg0: i32) -> (i32, i32) {
    %c0_i32 = arith.constant 0 : i32
    %c0_i32_0 = arith.constant 0 : i32
    return %arg0, %c0_i32 : i32, i32
  }
}

</mosaic_0001>

<bundles_post_ra>
// kernel: tpu_custom_call.1
= control target key start
LH: loop header
LB: loop body
LE: loop exit
PB: predicated region body
PF: predicated region fallthrough
CT: control target
= control target key end

     0   :  { %s2520_s0 = inlined_call_operand.hbm [shape: f32[16,128], index: 0, kind: input, shape index: {}]   ;;  %s2521_s1 = inlined_call_operand.hbm [shape: f32[16,128], index: 1, kind: input, shape index: {}]   ;;  %s2522_s2 = inlined_call_operand.hbm [shape: f32[16,128], index: 2, kind: input, shape index: {}]   ;;  %s2523_s3 = inlined_call_operand.hbm [shape: bf16[128,128], index: 3, kind: input, shape index: {}]   ;;  %s2524_s4 = inlined_call_operand.vmem [shape: f32[1,128], index: 4, kind: input, shape index: {}]   ;;  %s2525_s5 = inlined_call_operand.hbm [shape: bf16[128,128], index: 5, kind: input, shape index: {}]   ;;  %s2526_s6 = inlined_call_operand.vmem [shape: f32[1,128], index: 6, kind: input, shape index: {}]   ;;  %s2527_s7 = inlined_call_operand.hbm [shape: f32[16,128], index: 7, kind: output, shape index: {0}]   ;;  %s2528_s8 = inlined_call_operand.hbm [shape: f32[16,128], index: 8, kind: output, shape index: {1}]   ;;  %s2529_s9 = inlined_call_operand.hbm [shape: f32[16,128], index: 9, kind: output, shape index: {2}]  }
   0x1   :  { %2549 = sst [smem:[#allocation25_spill]] %s2520_s0 }
   0x2   :  { %2550 = sst [smem:[#allocation26_spill]] %s2523_s3 }
   0x3   :  { %2551 = sst [smem:[#allocation27_spill]] %s2528_s8 }
   0x4   :  { %2552 = sst [smem:[#allocation28_spill]] %s2529_s9 }
   0x5   :  { %15 = vsyncpa [#allocation3], 0 }
   0x6   :  { %17 = vsyncpa [#allocation3 + $0x1], 0 }
   0x7   :  { %18 = vsyncpa [#allocation6], 0 }
   0x8   :  { %20 = vsyncpa [#allocation6 + $0x1], 0 }
   0x9   :  { %21 = vsyncpa [#allocation9], 0 }
   0xa   :  { %22 = vsyncpa [#allocation4], 0 }
   0xb   :  { %24 = vsyncpa [#allocation4 + $0x1], 0 }
   0xc   :  { %25 = vsyncpa [#allocation13], 0 }
   0xd   :  { %27 = vsyncpa [#allocation13 + $0x1], 0  ;;  %s2114_s30 = smov 0   ;;  %s2116_s10 = smov 0  }
   0xe   :  { %s2118_s11 = smov 0   ;;  %s2120_s12 = smov 0  }
   0xf LB: > { %2553 = sst [smem:[#allocation20_spill]] %s2038_s30  ;;  %s2135_s13 = sadd.s32 4294967295, %s2050_s12   ;;  %s2050_s12 = sphi %s2120_s12, %s2585_s12   ;;  %s2046_s11 = sphi %s2118_s11, %s2589_s11   ;;  %s2042_s10 = sphi %s2116_s10, %s2588_s10   ;;  %s2038_s30 = sphi %s2114_s30, %s2587_s30  }
  0x10   : > { %2554 = sst [smem:[#allocation21_spill]] %s2050_s12  ;;  %s2530_s14 = sadd.s32 4294967294, %s2050_s12  }
  0x11   : > { %p53_p0 = scmp.ne.s32.totalorder %s2042_s10, %s2038_s30  ;;  %p2539_p1 = scmp.eq.s32.totalorder %s2135_s13, 0 }
  0x12   : > { %p213_p2 = scmp.eq.s32.totalorder %s2135_s13, 1  ;;  %p219_p3 = scmp.eq.s32.totalorder %s2530_s14, 1 }
  0x13   : > { %p2146_p4 = por %p2539_p1, %p53_p0  ;;  %p1392_p5 = scmp.ge.s32.totalorder %s2050_s12, 1 }
  0x14   : > { %p2151_p6 = por %p219_p3, %p53_p0  ;;  %p278_p7 = scmp.lt.s32.totalorder %s2050_s12, 3 }
  0x15   : > { %s2555_s15 = scalar_select %p2146_p4, 1, 0 }
  0x16   : > { %s2556_s16 = scalar_select %p2151_p6, 1, 0 }
  0x17   : > { %p2156_p8 = pnand %p1392_p5, %p278_p7  ;;  %s2052_s18 = smov [#allocation8]  }
  0x18   : > { %2557 = sst [smem:[#allocation22_spill]] %s2556_s16  ;;  %s290_s19 = sshll.u32 %s2052_s18, 4  ;;  %s291_s19 = int_to_ptr.vmem [resolvable:$true] %s290_s19 }
  0x19   : > { %s2558_s17 = scalar_select %p2156_p8, 1, 0 }
  0x1a   : > { %p1667_p9 = pneg %p2156_p8  ;;  %s2170_s21 = sadd.s32 1, %s2050_s12  }
  0x1b   : > { %2560 = sst [smem:[#allocation23_spill]] %s2170_s21  ;;  %s40_s22 = sadd.s32 1, %s2046_s11 }
  0x1c   : > { %p2165_p11 = pnand %p1667_p9, %p2539_p1  ;;  %s37_s23 = ssub.s32 %s2050_s12, %s2170_s21 }
  0x1d   : > { %s1797_s24 = scalar_lea.vmem %s291_s19, 1024  ;;  %p1805_p5 = scmp.lt.s32.totalorder %s291_s19, %s291_s19 }
  0x1e   : > { %s2559_s20 = scalar_select %p2165_p11, 1, 0 }
  0x1f   : > { %p2540_p12 = pneg %p2165_p11  ;;  %p1798_p13 = scmp.ne.s32.totalorder %s291_s19, %s1797_s24 }
  0x20   : > { %p1806_p7 = scmp.lt.s32.totalorder %s1797_s24, %s1797_s24 }
  0x21   : > { %p1800_p0 = pnand %p1798_p13, %p2540_p12 }
  0x22   : > { %p1807_p9 = por %p1806_p7, %p1805_p5 }
  0x23   : > { %p1801_p3 = pneg %p1800_p0 }
  0x25   : > { %p1808_p10 = pnand %p1807_p9, %p1801_p3 }
  0x27   : > { %1811 = shalt.err (!%p1808_p10)
}
  0x28   : > { %s2533_s25 = smov 64   ;;  %s2534_s26 = smov 4  }
  0x29   : > { %s2561_s3 = sld [smem:[#allocation26_spill]]  ;;  %p38_p10 = scmp.eq.s32.totalorder %s37_s23, 0 }
  0x2a   : > { %p47_p13 = scmp.ne.s32.totalorder %s2046_s11, %s2042_s10  ;;  %p48_p0 = scmp.eq.s32.totalorder %s2050_s12, 0 }
  0x2b   : > { %p1696_p3 = scmp.lt.s32.totalorder %s2050_s12, 2  ;;  %s2535_s24 = sand.u32 1, %s2046_s11  }
  0x2c   : > { %s2193_s29 = scalar_select %p38_p10, %s2046_s11, %s40_s22  }
  0x2d   : > { %p49_p5 = por %p48_p0, %p47_p13  ;;  %p2197_p7 = por %p213_p2, %p47_p13 }
  0x2e   : > { %2562 = sst [smem:[#allocation24_spill]] %s2193_s29  ;;  %s2203_s14 = sshll.u32 %s2050_s12, 7 }
  0x2f   : > { %1670 = dma.hbm_to_vmem [thread:$0]  (!%p2165_p11), %s2561_s3, 1024, %s291_s19, [#allocation9], %s2533_s25, %s2533_s25, %s2534_s26  }
  0x30   : > { %s2563_s18 = scalar_select %p2197_p7, 1, 0 }
  0x31   : > { %s2207_s21 = sshll.u32 %s2535_s24, 3  ;;  %p2209_p9 = pnand %p1696_p3, %p49_p5 }
  0x32   : > { %s341_s22 = sand.u32 1, %s2050_s12   ;;  %s2218_s28 = scalar_lea.hbm %s2521_s1, %s2203_s14 }
  0x33   : > { %s345_s25 = scalar_lea.vmem [#allocation5], %s2207_s21  ;;  %s2221_s24 = scalar_lea.sflag [#allocation6], %s341_s22 }
  0x34   : > { %s352_s26 = sshll.u32 %s345_s25, 4  ;;  %s1812_s3 = scalar_lea.hbm %s2218_s28, 128  ;;  %s353_s26 = int_to_ptr.vmem [resolvable:$true] %s352_s26 }
  0x35   : > { %p1813_p2 = scmp.ne.s32.totalorder %s2218_s28, %s1812_s3  ;;  %p2227_p10 = pneg %p2209_p9 }
  0x36   : > { %s1817_s12 = scalar_lea.hbm %s2521_s1, 256  ;;  %p1818_p3 = scmp.lt.s32.totalorder %s2218_s28, %s2521_s1 }
  0x37   : > { %p1815_p13 = pnand %p2227_p10, %p1813_p2  ;;  %p1819_p5 = scmp.lt.s32.totalorder %s1817_s12, %s1812_s3 }
  0x39   : > { %p1816_p0 = pneg %p1815_p13  ;;  %p1820_p1 = por %p1819_p5, %p1818_p3 }
  0x3b   : > { %p1821_p12 = pnand %p1820_p1, %p1816_p0 }
  0x3d   : > { %1824 = shalt.err (!%p1821_p12)
}
  0x3e   : > { %s1825_s22 = scalar_lea.vmem %s353_s26, 128  ;;  %s2055_s30 = smov [#allocation5]  }
  0x3f   : > { %p1826_p6 = scmp.ne.s32.totalorder %s353_s26, %s1825_s22  ;;  %s1830_s9 = sshll.u32 %s2055_s30, 4  ;;  %s1831_s9 = int_to_ptr.vmem [resolvable:$false] %s1830_s9 }
  0x40   : > { %s1832_s8 = scalar_lea.vmem %s1831_s9, 256  ;;  %p1833_p2 = scmp.lt.s32.totalorder %s353_s26, %s1831_s9 }
  0x41   : > { %p1828_p7 = pnand %p1826_p6, %p2227_p10  ;;  %p1834_p13 = scmp.lt.s32.totalorder %s1832_s8, %s1825_s22 }
  0x43   : > { %p1829_p4 = pneg %p1828_p7  ;;  %p1835_p8 = por %p1834_p13, %p1833_p2 }
  0x45   : > { %p1836_p11 = pnand %p1835_p8, %p1829_p4 }
  0x47   : > { %1839 = shalt.err (!%p1836_p11)
}
  0x48   : > { %1680 = dma.hbm_to_vmem [thread:$0]  (!%p2209_p9), %s2218_s28, 128, %s353_s26, %s2221_s24  }
  0x49   : > { %s2056_s3 = smov [#allocation10]   ;;  %p2566_p6 = scmp.ne.s32.totalorder %s2559_s20, 0 }
  0x4a   : > { %s306_s12 = sshll.u32 %s2056_s3, 4  ;;  %s307_s12 = int_to_ptr.vmem [resolvable:$true] %s306_s12 }
  0x4b   : > { %s1851_s16 = scalar_lea.vmem %s307_s12, 1024  ;;  %p2567_p12 = pneg %p2566_p6 }
  0x4c   : > { %p1852_p1 = scmp.ne.s32.totalorder %s307_s12, %s1851_s16  ;;  %p1859_p3 = scmp.lt.s32.totalorder %s307_s12, %s307_s12 }
  0x4d   : > { %p1860_p5 = scmp.lt.s32.totalorder %s1851_s16, %s1851_s16 }
  0x4e   : > { %p1854_p7 = pnand %p1852_p1, %p2567_p12 }
  0x4f   : > { %p1861_p2 = por %p1860_p5, %p1859_p3 }
  0x50   : > { %p1855_p0 = pneg %p1854_p7 }
  0x52   : > { %p1862_p4 = pnand %p1861_p2, %p1855_p0 }
  0x54   : > { %1865 = shalt.err (!%p1862_p4)
}
  0x55   : > { %s2568_s8 = smov 4   ;;  %s2569_s9 = smov 64  }
  0x56   : > { %1673 = dma.hbm_to_vmem [thread:$0]  (!%p2566_p6), %s2525_s5, 1024, %s307_s12, [#allocation9], %s2569_s9, %s2569_s9, %s2568_s8  }
  0x57   : > { %s2570_s0 = sld [smem:[#allocation25_spill]]  ;;  %s327_s20 = scalar_lea.vmem [#allocation2], %s2207_s21 }
  0x58   : > { %s334_s25 = sshll.u32 %s327_s20, 4  ;;  %s2571_s22 = sand.u32 1, %s2046_s11   ;;  %s335_s25 = int_to_ptr.vmem [resolvable:$true] %s334_s25 }
  0x59   : > { %s324_s3 = scalar_lea.sflag [#allocation3], %s2571_s22 }
  0x5d   : > { %s2261_s27 = scalar_lea.hbm %s2570_s0, %s2203_s14  ;;  %s1871_s8 = scalar_lea.hbm %s2570_s0, 256 }
  0x5e   : > { %s1866_s16 = scalar_lea.hbm %s2261_s27, 128  ;;  %p1872_p1 = scmp.lt.s32.totalorder %s2261_s27, %s2570_s0 }
  0x5f   : > { %p1867_p8 = scmp.ne.s32.totalorder %s2261_s27, %s1866_s16  ;;  %p1873_p6 = scmp.lt.s32.totalorder %s1871_s8, %s1866_s16 }
  0x61   : > { %p1869_p11 = pnand %p1867_p8, %p2227_p10  ;;  %p1874_p12 = por %p1873_p6, %p1872_p1 }
  0x63   : > { %p1870_p13 = pneg %p1869_p11 }
  0x65   : > { %p1875_p7 = pnand %p1874_p12, %p1870_p13 }
  0x67   : > { %1878 = shalt.err (!%p1875_p7)
}
  0x68   : > { %s1879_s28 = scalar_lea.vmem %s335_s25, 128  ;;  %s2057_s23 = smov [#allocation2]  }
  0x69   : > { %p1880_p0 = scmp.ne.s32.totalorder %s335_s25, %s1879_s28  ;;  %s1884_s20 = sshll.u32 %s2057_s23, 4  ;;  %s1885_s20 = int_to_ptr.vmem [resolvable:$false] %s1884_s20 }
  0x6a   : > { %s1886_s22 = scalar_lea.vmem %s1885_s20, 256  ;;  %p1887_p2 = scmp.lt.s32.totalorder %s335_s25, %s1885_s20 }
  0x6b   : > { %p1882_p3 = pnand %p1880_p0, %p2227_p10  ;;  %p1888_p4 = scmp.lt.s32.totalorder %s1886_s22, %s1879_s28 }
  0x6d   : > { %p1883_p5 = pneg %p1882_p3  ;;  %p1889_p8 = por %p1888_p4, %p1887_p2 }
  0x6f   : > { %p1890_p11 = pnand %p1889_p8, %p1883_p5 }
  0x71   : > { %1893 = shalt.err (!%p1890_p11)
}
  0x72   : > { %1677 = dma.hbm_to_vmem [thread:$0]  (!%p2209_p9), %s2261_s27, 128, %s335_s25, %s324_s3  }
  0x73   : > { %s368_s12 = scalar_lea.hbm %s2522_s2, %s2203_s14  ;;  %s363_s8 = scalar_lea.vmem [#allocation7], %s2207_s21 }
  0x74   : > { %s370_s9 = sshll.u32 %s363_s8, 4  ;;  %s1894_s26 = scalar_lea.hbm %s368_s12, 128  ;;  %s371_s9 = int_to_ptr.vmem [resolvable:$true] %s370_s9 }
  0x75   : > { %p1895_p13 = scmp.ne.s32.totalorder %s368_s12, %s1894_s26  ;;  %s1899_s20 = scalar_lea.hbm %s2522_s2, 256 }
  0x76   : > { %p1900_p12 = scmp.lt.s32.totalorder %s368_s12, %s2522_s2  ;;  %p1901_p7 = scmp.lt.s32.totalorder %s1899_s20, %s1894_s26 }
  0x77   : > { %p1897_p1 = pnand %p1895_p13, %p2227_p10 }
  0x78   : > { %p1902_p0 = por %p1901_p7, %p1900_p12 }
  0x79   : > { %p1898_p6 = pneg %p1897_p1 }
  0x7b   : > { %p1903_p3 = pnand %p1902_p0, %p1898_p6 }
  0x7d   : > { %1906 = shalt.err (!%p1903_p3)
}
  0x7e   : > { %s1907_s14 = scalar_lea.vmem %s371_s9, 128  ;;  %s2058_s21 = smov [#allocation7]  }
  0x7f   : > { %p1908_p5 = scmp.ne.s32.totalorder %s371_s9, %s1907_s14  ;;  %s1912_s27 = sshll.u32 %s2058_s21, 4  ;;  %s1913_s27 = int_to_ptr.vmem [resolvable:$false] %s1912_s27 }
  0x80   : > { %s1914_s25 = scalar_lea.vmem %s1913_s27, 256  ;;  %p1915_p8 = scmp.lt.s32.totalorder %s371_s9, %s1913_s27 }
  0x81   : > { %p1910_p2 = pnand %p1908_p5, %p2227_p10  ;;  %p1916_p11 = scmp.lt.s32.totalorder %s1914_s25, %s1907_s14 }
  0x83   : > { %p1911_p4 = pneg %p1910_p2  ;;  %p1917_p13 = por %p1916_p11, %p1915_p8 }
  0x85   : > { %p1918_p1 = pnand %p1917_p13, %p1911_p4 }
  0x87   : > { %1921 = shalt.err (!%p1918_p1)
}
  0x88   : > { %1683 = dma.hbm_to_vmem [thread:$0]  (!%p2209_p9), %s368_s12, 128, %s371_s9, %s2221_s24  }
  0x89   : > { %p2572_p6 = scmp.ne.s32.totalorder %s2558_s17, 0 }
  0x8a   : > { %s2303_s0 = sand.u32 (!%p2572_p6), 1, %s2042_s10   ;;  %p2573_p10 = scmp.ne.s32.totalorder (!%p2572_p6), %s2555_s15, 0 }
  0x8b   : > { %379 = sbr.rel (%p2572_p6) target bundleno = 657 (0x291), region = 48  ;;  %s2306_s29 = sshll.u32 (!%p2572_p6), %s2303_s0, 3 }
  0x8c   : > { %s382_s3 = scalar_lea.sflag (!%p2572_p6), [#allocation3], %s2303_s0  ;;  %s385_s16 = scalar_lea.vmem (!%p2572_p6), [#allocation2], %s2306_s29 }
  0x90   : > { %2017 = dma.done.wait (%p2573_p10), %s382_s3, 128  }
  0x91   : > { %2019 = vsyncadd (%p2573_p10), %s382_s3, 4294967168  ;;  %s390_s17 = sand.u32 1, %s2135_s13   ;;  %s394_s19 = scalar_lea.vmem [#allocation5], %s2306_s29 }
  0x92   : > { %s391_s24 = scalar_lea.sflag [#allocation6], %s390_s17 }
  0x93   : > { %2021 = dma.done.wait (%p2573_p10), %s391_s24, 256  }
  0x94   : > { %2023 = vsyncadd (%p2573_p10), %s391_s24, 4294967040  ;;  %s403_s30 = scalar_lea.vmem [#allocation7], %s2306_s29  ;;  %p2574_p9 = scmp.eq.s32.totalorder %s2135_s13, 0 }
  0x96   : > { %2025 = dma.done.wait (%p2574_p9), [#allocation9], 2048   ;;  %p2575_p12 = pmov %p2574_p9 }
  0x97   : > { %v2059_v0 = vmov 0.0   ;;  %vm2060_vm0 = vmmov 0   ;;  %v1738_v1 = vld [vmem:[#allocation8 + $0x38] sm:$0xff]   ;;  %v1739_v2 = vld [vmem:[#allocation8 + $0x30] sm:$0xff]   ;;  %v1740_v3 = vld [vmem:[#allocation8 + $0x28] sm:$0xff]   ;;  %s2407_s26 = sshll.u32 %s2135_s13, 7 }
  0x98   : > { %2027 = vsyncadd (%p2575_p12), [#allocation9], 4294965248  ;;  %1527 = vmatprep.subr.bf16.mxu0 %v2059_v0  ;;  %1543 = vmatprep.mubr.msk.bf16.mxu0 %vm2060_vm0, %v2059_v0  ;;  %v1741_v4 = vld [vmem:[#allocation8 + $0x20] sm:$0xff]   ;;  %v1742_v5 = vld [vmem:[#allocation8 + $0x18] sm:$0xff]   ;;  %s451_s28 = scalar_lea.vmem [#allocation11], %s2306_s29  ;;  %s2415_s14 = scalar_lea.hbm %s2527_s7, %s2407_s26 }
  0x99   : > { %1547 = vmatprep.subr.bf16.mxu1 %v2059_v0  ;;  %1563 = vmatprep.mubr.msk.bf16.mxu1 %vm2060_vm0, %v2059_v0  ;;  %v1743_v6 = vld [vmem:[#allocation8 + $0x10] sm:$0xff]   ;;  %v1744_v7 = vld [vmem:[#allocation8 + $0x8] sm:$0xff]   ;;  %v1745_v8 = vld [vmem:[#allocation8] sm:$0xff]   ;;  %s1172_s23 = sshll.u32 %s451_s28, 4  ;;  %s1149_s21 = scalar_lea.sflag [#allocation4], %s2303_s0  ;;  %s2417_s23 = int_to_ptr.vmem [resolvable:$true] %s1172_s23 }
  0x9a   : > { %1528 = vmatpush3.bf16.msra.mxu0 %v1738_v1  ;;  %v1762_v9 = vld [vmem:[#allocation10 + $0x38] sm:$0xff]   ;;  %v1763_v11 = vld [vmem:[#allocation10 + $0x30] sm:$0xff]   ;;  %v1764_v14 = vld [vmem:[#allocation10 + $0x28] sm:$0xff]   ;;  %s1922_s27 = scalar_lea.vmem %s2417_s23, 128  ;;  %p2576_p0 = scmp.ne.s32.totalorder %s2563_s18, 0 }
  0x9b   : > { %1529 = vmatprep.subr.bf16.mxu0 %v2059_v0  ;;  %v467_v10 = vld [vmem:[%s385_s16] sm:$0xff]  ;;  %1548 = vmatpush3.bf16.msra.mxu1 %v1762_v9  ;;  %v1765_v16 = vld [vmem:[#allocation10 + $0x20] sm:$0xff]   ;;  %v1748_v17 = vld [vmem:[#allocation8 + $0x28] sm:$0xff]   ;;  %p1923_p7 = scmp.ne.s32.totalorder %s2417_s23, %s1922_s27  ;;  %s2061_s25 = smov [#allocation11]  }
  0x9c   : > { %1549 = vmatprep.subr.bf16.mxu1 %v2059_v0  ;;  %v468_v12 = vpack.c.bf16 %v467_v10, %v467_v10  ;;  %v1746_v13 = vld [vmem:[#allocation8 + $0x38] sm:$0xff]   ;;  %v1747_v15 = vld [vmem:[#allocation8 + $0x30] sm:$0xff]   ;;  %v1749_v19 = vld [vmem:[#allocation8 + $0x20] sm:$0xff]   ;;  %s1926_s3 = sshll.u32 %s2061_s25, 4  ;;  %s1927_s3 = int_to_ptr.vmem [resolvable:$false] %s1926_s3 }
  0x9d   : > { %v1766_v18 = vld [vmem:[#allocation10 + $0x18] sm:$0xff]   ;;  %v1767_v20 = vld [vmem:[#allocation10 + $0x10] sm:$0xff]   ;;  %v1752_v23 = vld [vmem:[#allocation8 + $0x8] sm:$0xff]   ;;  %p1924_p3 = pnand %p1923_p7, %p2576_p0  ;;  %s1928_s16 = scalar_lea.vmem %s1927_s3, 256 }
  0x9e   : > { %1530 = vmatpush3.bf16.msra.mxu0 %v1739_v2  ;;  %v1750_v21 = vld [vmem:[#allocation8 + $0x18] sm:$0xff]   ;;  %v1751_v22 = vld [vmem:[#allocation8 + $0x10] sm:$0xff]   ;;  %v1753_v24 = vld [vmem:[#allocation8] sm:$0xff]   ;;  %p1929_p2 = scmp.lt.s32.totalorder %s2417_s23, %s1927_s3  ;;  %p1930_p4 = scmp.lt.s32.totalorder %s1928_s16, %s1922_s27 }
  0x9f   : > { %1531 = vmatprep.subr.bf16.mxu0 %v2059_v0  ;;  %1550 = vmatpush3.bf16.msra.mxu1 %v1763_v11  ;;  %v694_v25 = vld [vmem:[%s394_s19] sm:$0xff]  ;;  %v1754_v27 = vld [vmem:[#allocation8 + $0x38] sm:$0xff]   ;;  %v1755_v28 = vld [vmem:[#allocation8 + $0x30] sm:$0xff]   ;;  %p1925_p5 = pneg %p1924_p3 }
  0xa0   : > { %1551 = vmatprep.subr.bf16.mxu1 %v2059_v0  ;;  %v695_v26 = vpack.c.bf16 %v694_v25, %v694_v25  ;;  %v1756_v29 = vld [vmem:[#allocation8 + $0x28] sm:$0xff]   ;;  %v1757_v30 = vld [vmem:[#allocation8 + $0x20] sm:$0xff]   ;;  %v1758_v31 = vld [vmem:[#allocation8 + $0x18] sm:$0xff]   ;;  %p1931_p8 = por %p1930_p4, %p1929_p2 }
  0xa1   : > { %v1759_v32 = vld [vmem:[#allocation8 + $0x10] sm:$0xff]   ;;  %v1760_v33 = vld [vmem:[#allocation8 + $0x8] sm:$0xff]   ;;  %v1761_v34 = vld [vmem:[#allocation8] sm:$0xff]  }
  0xa2   : > { %1532 = vmatpush3.bf16.msra.mxu0 %v1740_v3  ;;  %v921_v35 = vld [vmem:[%s403_s30] sm:$0xff]  ;;  %v1768_v37 = vld [vmem:[#allocation10 + $0x8] sm:$0xff]   ;;  %v1769_v38 = vld [vmem:[#allocation10] sm:$0xff]   ;;  %p1932_p11 = pnand %p1931_p8, %p1925_p5 }
  0xa3   : > { %1533 = vmatprep.subr.bf16.mxu0 %v2059_v0  ;;  %1552 = vmatpush3.bf16.msra.mxu1 %v1764_v14  ;;  %v922_v36 = vpack.c.bf16 %v921_v35, %v921_v35  ;;  %v2377_v39 = vld [vmem:[%s2524_s4] ss:$0 sm:$0xff]  ;;  %v1770_v45 = vld [vmem:[#allocation10 + $0x38] sm:$0xff]   ;;  %v1772_v49 = vld [vmem:[#allocation10 + $0x28] sm:$0xff]  }
  0xa4   : > { %1553 = vmatprep.subr.bf16.mxu1 %v2059_v0  ;;  %v1771_v48 = vld [vmem:[#allocation10 + $0x30] sm:$0xff]   ;;  %v1773_v50 = vld [vmem:[#allocation10 + $0x20] sm:$0xff]   ;;  %v1774_v51 = vld [vmem:[#allocation10 + $0x18] sm:$0xff]  }
  0xa5   : > { %v1775_v52 = vld [vmem:[#allocation10 + $0x10] sm:$0xff]   ;;  %v1776_v53 = vld [vmem:[#allocation10 + $0x8] sm:$0xff]   ;;  %v1777_v55 = vld [vmem:[#allocation10] sm:$0xff]  }
  0xa6   : > { %1534 = vmatpush3.bf16.msra.mxu0 %v1741_v4  ;;  %v1778_v60 = vld [vmem:[#allocation10 + $0x38] sm:$0xff]   ;;  %v1779_v63 = vld [vmem:[#allocation10 + $0x30] sm:$0xff]   ;;  %v1780_v1 = vld [vmem:[#allocation10 + $0x28] sm:$0xff]  }
  0xa7   : > { %1535 = vmatprep.subr.bf16.mxu0 %v2059_v0  ;;  %1554 = vmatpush3.bf16.msra.mxu1 %v1765_v16  ;;  %v1781_v2 = vld [vmem:[#allocation10 + $0x20] sm:$0xff]   ;;  %v1782_v3 = vld [vmem:[#allocation10 + $0x18] sm:$0xff]   ;;  %v1783_v4 = vld [vmem:[#allocation10 + $0x10] sm:$0xff]  }
  0xa8   : > { %1555 = vmatprep.subr.bf16.mxu1 %v2059_v0  ;;  %v2404_v14 = vld [vmem:[%s2526_s6] ss:$0 sm:$0xff] }
  0xaa   : > { %1536 = vmatpush3.bf16.msra.mxu0 %v1742_v5  ;;  %v1784_v5 = vld [vmem:[#allocation10 + $0x8] sm:$0xff]  }
  0xab   : > { %1537 = vmatprep.subr.bf16.mxu0 %v2059_v0  ;;  %1556 = vmatpush3.bf16.msra.mxu1 %v1766_v18 }
  0xac   : > { %1557 = vmatprep.subr.bf16.mxu1 %v2059_v0 }
  0xae   : > { %1538 = vmatpush3.bf16.msra.mxu0 %v1743_v6 }
  0xaf   : > { %1539 = vmatprep.subr.bf16.mxu0 %v2059_v0  ;;  %1558 = vmatpush3.bf16.msra.mxu1 %v1767_v20 }
  0xb0   : > { %1559 = vmatprep.subr.bf16.mxu1 %v2059_v0 }
  0xb2   : > { %1540 = vmatpush3.bf16.msra.mxu0 %v1744_v7  ;;  %v1785_v7 = vld [vmem:[#allocation10] sm:$0xff]  }
  0xb3   : > { %1541 = vmatprep.subr.bf16.mxu0 %v2059_v0  ;;  %1560 = vmatpush3.bf16.msra.mxu1 %v1768_v37 }
  0xb4   : > { %1561 = vmatprep.subr.bf16.mxu1 %v2059_v0 }
  0xb6   : > { %1542 = vmatpush3.bf16.msra.mxu0 %v1745_v8 }
  0xb7   : > { %1567 = vmatprep.subr.bf16.mxu0 %v2059_v0  ;;  %1562 = vmatpush3.bf16.msra.mxu1 %v1769_v38 }
  0xb8   : > { %1587 = vmatprep.subr.bf16.mxu1 %v2059_v0 }
  0xb9   : > { %1544 = vmatmul.mubr.bf16.vlgmr.msra.gmra.mxu0 %v468_v12 }
  0xba   : > { %1568 = vmatpush3.bf16.msra.mxu0 %v1746_v13  ;;  %1583 = vmatprep.mubr.msk.bf16.mxu0 %vm2060_vm0, %v2059_v0 }
  0xbb   : > { %1569 = vmatprep.subr.bf16.mxu0 %v2059_v0 }
  0xbe   : > { %1570 = vmatpush3.bf16.msra.mxu0 %v1747_v15 }
  0xbf   : > { %1571 = vmatprep.subr.bf16.mxu0 %v2059_v0 }
  0xc2   : > { %1572 = vmatpush3.bf16.msra.mxu0 %v1748_v17 }
  0xc3   : > { %1573 = vmatprep.subr.bf16.mxu0 %v2059_v0 }
  0xc6   : > { %1574 = vmatpush3.bf16.msra.mxu0 %v1749_v19 }
  0xc7   : > { %1575 = vmatprep.subr.bf16.mxu0 %v2059_v0 }
  0xca   : > { %1576 = vmatpush3.bf16.msra.mxu0 %v1750_v21 }
  0xcb   : > { %1577 = vmatprep.subr.bf16.mxu0 %v2059_v0 }
  0xce   : > { %1578 = vmatpush3.bf16.msra.mxu0 %v1751_v22 }
  0xcf   : > { %1579 = vmatprep.subr.bf16.mxu0 %v2059_v0 }
  0xd2   : > { %1580 = vmatpush3.bf16.msra.mxu0 %v1752_v23 }
  0xd3   : > { %1581 = vmatprep.subr.bf16.mxu0 %v2059_v0 }
  0xd6   : > { %1582 = vmatpush3.bf16.msra.mxu0 %v1753_v24 }
  0xd7   : > { %1607 = vmatprep.subr.bf16.mxu0 %v2059_v0 }
  0xd9   : > { %1584 = vmatmul.mubr.bf16.vlgmr.msra.gmra.mxu0 %v695_v26 }
  0xda   : > { %1608 = vmatpush3.bf16.msra.mxu0 %v1754_v27  ;;  %1623 = vmatprep.mubr.msk.bf16.mxu0 %vm2060_vm0, %v2059_v0 }
  0xdb   : > { %1609 = vmatprep.subr.bf16.mxu0 %v2059_v0 }
  0xde   : > { %1610 = vmatpush3.bf16.msra.mxu0 %v1755_v28 }
  0xdf   : > { %1611 = vmatprep.subr.bf16.mxu0 %v2059_v0 }
  0xe2   : > { %1612 = vmatpush3.bf16.msra.mxu0 %v1756_v29 }
  0xe3   : > { %1613 = vmatprep.subr.bf16.mxu0 %v2059_v0 }
  0xe6   : > { %1614 = vmatpush3.bf16.msra.mxu0 %v1757_v30 }
  0xe7   : > { %1615 = vmatprep.subr.bf16.mxu0 %v2059_v0 }
  0xea   : > { %1616 = vmatpush3.bf16.msra.mxu0 %v1758_v31 }
  0xeb   : > { %1617 = vmatprep.subr.bf16.mxu0 %v2059_v0 }
  0xee   : > { %1618 = vmatpush3.bf16.msra.mxu0 %v1759_v32 }
  0xef   : > { %1619 = vmatprep.subr.bf16.mxu0 %v2059_v0 }
  0xf2   : > { %1620 = vmatpush3.bf16.msra.mxu0 %v1760_v33 }
  0xf3   : > { %1621 = vmatprep.subr.bf16.mxu0 %v2059_v0 }
  0xf6   : > { %1622 = vmatpush3.bf16.msra.mxu0 %v1761_v34 }
  0xf9   : > { %1624 = vmatmul.mubr.bf16.vlgmr.msra.gmra.mxu0 %v922_v36 }
 0x179   : > { %v574_v40 = vpop.f32.mrf.mxu0 }
 0x17a   : > { %v575_v41 = vadd.f32 %v2377_v39, %v574_v40 }
 0x17b   : > { %v1545_v42 = vpop.f32.mrf.mxu0 }
 0x17c   : > { %v580_v43 = vmax.f32 %v575_v41, 0.0 }
 0x17d   : > { %v577_v44 = vpop.f32.mrf.mxu0 }
 0x17e   : > { %v581_v46 = vpack.c.bf16 %v580_v43, %v580_v43 }
 0x17f   : > { %v1546_v47 = vpop.f32.mrf.mxu0 }
 0x180   : > { %1564 = vmatmul.mubr.bf16.vlgmr.msra.gmra.mxu1 %v581_v46 }
 0x181   : > { %1588 = vmatpush3.bf16.msra.mxu1 %v1770_v45  ;;  %1603 = vmatprep.mubr.msk.bf16.mxu1 %vm2060_vm0, %v2059_v0 }
 0x182   : > { %1589 = vmatprep.subr.bf16.mxu1 %v2059_v0 }
 0x185   : > { %1590 = vmatpush3.bf16.msra.mxu1 %v1771_v48 }
 0x186   : > { %1591 = vmatprep.subr.bf16.mxu1 %v2059_v0 }
 0x189   : > { %1592 = vmatpush3.bf16.msra.mxu1 %v1772_v49 }
 0x18a   : > { %1593 = vmatprep.subr.bf16.mxu1 %v2059_v0 }
 0x18d   : > { %1594 = vmatpush3.bf16.msra.mxu1 %v1773_v50 }
 0x18e   : > { %1595 = vmatprep.subr.bf16.mxu1 %v2059_v0 }
 0x191   : > { %1596 = vmatpush3.bf16.msra.mxu1 %v1774_v51 }
 0x192   : > { %1597 = vmatprep.subr.bf16.mxu1 %v2059_v0 }
 0x195   : > { %1598 = vmatpush3.bf16.msra.mxu1 %v1775_v52 }
 0x196   : > { %1599 = vmatprep.subr.bf16.mxu1 %v2059_v0 }
 0x199   : > { %v801_v54 = vpop.f32.mrf.mxu0  ;;  %1600 = vmatpush3.bf16.msra.mxu1 %v1776_v53 }
 0x19a   : > { %v802_v56 = vadd.f32 %v2377_v39, %v801_v54  ;;  %1601 = vmatprep.subr.bf16.mxu1 %v2059_v0 }
 0x19b   : > { %v1585_v57 = vpop.f32.mrf.mxu0 }
 0x19c   : > { %v807_v58 = vmax.f32 %v802_v56, 0.0 }
 0x19d   : > { %v804_v59 = vpop.f32.mrf.mxu0  ;;  %1602 = vmatpush3.bf16.msra.mxu1 %v1777_v55 }
 0x19e   : > { %v808_v61 = vpack.c.bf16 %v807_v58, %v807_v58  ;;  %1627 = vmatprep.subr.bf16.mxu1 %v2059_v0 }
 0x19f   : > { %v1586_v62 = vpop.f32.mrf.mxu0 }
 0x1a0   : > { %1604 = vmatmul.mubr.bf16.vlgmr.msra.gmra.mxu1 %v808_v61 }
 0x1a1   : > { %1628 = vmatpush3.bf16.msra.mxu1 %v1778_v60  ;;  %1643 = vmatprep.mubr.msk.bf16.mxu1 %vm2060_vm0, %v2059_v0 }
 0x1a2   : > { %1629 = vmatprep.subr.bf16.mxu1 %v2059_v0 }
 0x1a5   : > { %1630 = vmatpush3.bf16.msra.mxu1 %v1779_v63 }
 0x1a6   : > { %1631 = vmatprep.subr.bf16.mxu1 %v2059_v0 }
 0x1a9   : > { %1632 = vmatpush3.bf16.msra.mxu1 %v1780_v1 }
 0x1aa   : > { %1633 = vmatprep.subr.bf16.mxu1 %v2059_v0 }
 0x1ad   : > { %1634 = vmatpush3.bf16.msra.mxu1 %v1781_v2 }
 0x1ae   : > { %1635 = vmatprep.subr.bf16.mxu1 %v2059_v0 }
 0x1b1   : > { %1636 = vmatpush3.bf16.msra.mxu1 %v1782_v3 }
 0x1b2   : > { %1637 = vmatprep.subr.bf16.mxu1 %v2059_v0 }
 0x1b5   : > { %1638 = vmatpush3.bf16.msra.mxu1 %v1783_v4 }
 0x1b6   : > { %1639 = vmatprep.subr.bf16.mxu1 %v2059_v0 }
 0x1b9   : > { %v1028_v6 = vpop.f32.mrf.mxu0  ;;  %1640 = vmatpush3.bf16.msra.mxu1 %v1784_v5 }
 0x1ba   : > { %v1029_v8 = vadd.f32 %v2377_v39, %v1028_v6  ;;  %1641 = vmatprep.subr.bf16.mxu1 %v2059_v0 }
 0x1bb   : > { %v1625_v9 = vpop.f32.mrf.mxu0 }
 0x1bc   : > { %v1034_v10 = vmax.f32 %v1029_v8, 0.0 }
 0x1bd   : > { %v1031_v11 = vpop.f32.mrf.mxu0  ;;  %1642 = vmatpush3.bf16.msra.mxu1 %v1785_v7 }
 0x1be   : > { %v1035_v12 = vpack.c.bf16 %v1034_v10, %v1034_v10 }
 0x1bf   : > { %v1626_v13 = vpop.f32.mrf.mxu0 }
 0x1c0   : > { %1644 = vmatmul.mubr.bf16.vlgmr.msra.gmra.mxu1 %v1035_v12 }
 0x240   : > { %v687_v0 = vpop.f32.mrf.mxu1 }
 0x241   : > { %v688_v15 = vadd.f32 %v2404_v14, %v687_v0 }
 0x242   : > { %v1565_v16 = vpop.f32.mrf.mxu1 }
 0x243   : > { %693 = vst [vmem:[%s451_s28] sm:$0xff] %v688_v15 }
 0x244   : > { %v690_v17 = vpop.f32.mrf.mxu1 }
 0x245   : > { %1935 = shalt.err (!%p1932_p11)
}
 0x246   : > { %s1936_s24 = scalar_lea.hbm %s2415_s14, 128  ;;  %s1940_s30 = scalar_lea.hbm %s2527_s7, 256 }
 0x247   : > { %p1937_p13 = scmp.ne.s32.totalorder %s2415_s14, %s1936_s24  ;;  %p1941_p10 = scmp.lt.s32.totalorder %s2415_s14, %s2527_s7 }
 0x248   : > { %p1942_p9 = scmp.lt.s32.totalorder %s1940_s30, %s1936_s24 }
 0x249   : > { %p1938_p1 = pnand %p1937_p13, %p2576_p0 }
 0x24a   : > { %p1943_p12 = por %p1942_p9, %p1941_p10 }
 0x24b   : > { %p1939_p6 = pneg %p1938_p1 }
 0x24d   : > { %p1944_p7 = pnand %p1943_p12, %p1939_p6 }
 0x24f   : > { %1947 = shalt.err (!%p1944_p7)
}
 0x250   : > { %1661 = dma.vmem_to_hbm [thread:$0]  (%p2576_p0), %s2417_s23, 128, %s2415_s14, %s1149_s21   ;;  %v1566_v18 = vpop.f32.mrf.mxu1 }
 0x251   : > { %s458_s8 = scalar_lea.vmem [#allocation12], %s2306_s29  ;;  %s2577_s22 = sld [smem:[#allocation27_spill]] }
 0x252   : > { %s1185_s9 = sshll.u32 %s458_s8, 4  ;;  %s2452_s23 = scalar_lea.sflag [#allocation13], %s390_s17  ;;  %s2448_s9 = int_to_ptr.vmem [resolvable:$true] %s1185_s9 }
 0x253   : > { %s1948_s14 = scalar_lea.vmem %s2448_s9, 128  ;;  %s2062_s21 = smov [#allocation12]  }
 0x254   : > { %p1949_p3 = scmp.ne.s32.totalorder %s2448_s9, %s1948_s14  ;;  %s1952_s25 = sshll.u32 %s2062_s21, 4  ;;  %s1953_s25 = int_to_ptr.vmem [resolvable:$false] %s1952_s25 }
 0x255   : > { %s1954_s3 = scalar_lea.vmem %s1953_s25, 256  ;;  %p1955_p4 = scmp.lt.s32.totalorder %s2448_s9, %s1953_s25 }
 0x256   : > { %p1950_p5 = pnand %p1949_p3, %p2576_p0  ;;  %p1956_p8 = scmp.lt.s32.totalorder %s1954_s3, %s1948_s14 }
 0x257   : > { %s2446_s27 = scalar_lea.hbm %s2577_s22, %s2407_s26 }
 0x258   : > { %p1951_p2 = pneg %p1950_p5  ;;  %p1957_p11 = por %p1956_p8, %p1955_p4 }
 0x25a   : > { %p1958_p13 = pnand %p1957_p11, %p1951_p2 }
 0x260   : > { %v914_v19 = vpop.f32.mrf.mxu1 }
 0x261   : > { %v915_v20 = vadd.f32 %v2404_v14, %v914_v19 }
 0x262   : > { %v1605_v21 = vpop.f32.mrf.mxu1 }
 0x263   : > { %920 = vst [vmem:[%s458_s8] sm:$0xff] %v915_v20 }
 0x264   : > { %v917_v22 = vpop.f32.mrf.mxu1 }
 0x265   : > { %1961 = shalt.err (!%p1958_p13)
}
 0x266   : > { %s1962_s13 = scalar_lea.hbm %s2446_s27, 128  ;;  %s1966_s24 = scalar_lea.hbm %s2577_s22, 256 }
 0x267   : > { %p1963_p1 = scmp.ne.s32.totalorder %s2446_s27, %s1962_s13  ;;  %p1967_p9 = scmp.lt.s32.totalorder %s2446_s27, %s2577_s22 }
 0x268   : > { %p1968_p12 = scmp.lt.s32.totalorder %s1966_s24, %s1962_s13 }
 0x269   : > { %p1964_p6 = pnand %p1963_p1, %p2576_p0 }
 0x26a   : > { %p1969_p7 = por %p1968_p12, %p1967_p9 }
 0x26b   : > { %p1965_p10 = pneg %p1964_p6 }
 0x26d   : > { %p1970_p3 = pnand %p1969_p7, %p1965_p10 }
 0x26f   : > { %1973 = shalt.err (!%p1970_p3)
}
 0x270   : > { %1662 = dma.vmem_to_hbm [thread:$0]  (%p2576_p0), %s2448_s9, 128, %s2446_s27, %s2452_s23   ;;  %v1606_v23 = vpop.f32.mrf.mxu1 }
 0x271   : > { %s465_s30 = scalar_lea.vmem [#allocation14], %s2306_s29  ;;  %s2578_s28 = sld [smem:[#allocation28_spill]] }
 0x272   : > { %s1198_s15 = sshll.u32 %s465_s30, 4  ;;  %s2063_s9 = smov [#allocation14]   ;;  %s1199_s15 = int_to_ptr.vmem [resolvable:$true] %s1198_s15 }
 0x273   : > { %s1974_s14 = scalar_lea.vmem %s1199_s15, 128  ;;  %s1978_s29 = sshll.u32 %s2063_s9, 4  ;;  %s1979_s29 = int_to_ptr.vmem [resolvable:$false] %s1978_s29 }
 0x274   : > { %p1975_p5 = scmp.ne.s32.totalorder %s1199_s15, %s1974_s14  ;;  %s1980_s27 = scalar_lea.vmem %s1979_s29, 256 }
 0x275   : > { %p1981_p8 = scmp.lt.s32.totalorder %s1199_s15, %s1979_s29  ;;  %p1982_p11 = scmp.lt.s32.totalorder %s1980_s27, %s1974_s14 }
 0x276   : > { %p1976_p2 = pnand %p1975_p5, %p2576_p0 }
 0x277   : > { %s2481_s20 = scalar_lea.hbm %s2578_s28, %s2407_s26  ;;  %p1983_p13 = por %p1982_p11, %p1981_p8 }
 0x278   : > { %p1977_p4 = pneg %p1976_p2 }
 0x27a   : > { %p1984_p1 = pnand %p1983_p13, %p1977_p4 }
 0x280   : > { %v1141_v24 = vpop.f32.mrf.mxu1 }
 0x281   : > { %v1142_v25 = vadd.f32 %v2404_v14, %v1141_v24 }
 0x282   : > { %v1645_v26 = vpop.f32.mrf.mxu1 }
 0x283   : > { %1147 = vst [vmem:[%s465_s30] sm:$0xff] %v1142_v25 }
 0x284   : > { %v1144_v27 = vpop.f32.mrf.mxu1 }
 0x285   : > { %1987 = shalt.err (!%p1984_p1)
}
 0x286   : > { %s1988_s26 = scalar_lea.hbm %s2481_s20, 128  ;;  %s1992_s3 = scalar_lea.hbm %s2578_s28, 256 }
 0x287   : > { %p1989_p6 = scmp.ne.s32.totalorder %s2481_s20, %s1988_s26  ;;  %p1993_p12 = scmp.lt.s32.totalorder %s2481_s20, %s2578_s28 }
 0x288   : > { %p1994_p7 = scmp.lt.s32.totalorder %s1992_s3, %s1988_s26 }
 0x289   : > { %p1990_p10 = pnand %p1989_p6, %p2576_p0 }
 0x28a   : > { %p1995_p3 = por %p1994_p7, %p1993_p12 }
 0x28b   : > { %p1991_p9 = pneg %p1990_p10 }
 0x28d   : > { %p1996_p5 = pnand %p1995_p3, %p1991_p9 }
 0x28f   : > { %1999 = shalt.err (!%p1996_p5)
}
 0x290   : > { %1663 = dma.vmem_to_hbm [thread:$0]  (%p2576_p0), %s1199_s15, 128, %s2481_s20, %s2452_s23   ;;  %v1646_v28 = vpop.f32.mrf.mxu1 }
 0x291 PF: > { %s2579_s16 = sld [smem:[#allocation20_spill]] }
 0x292   : > { %s2580_s24 = sld [smem:[#allocation22_spill]] }
 0x293   : > { %s2581_s0 = sld [smem:[#allocation21_spill]] }
 0x297   : > { %s1210_s19 = sand.u32 1, %s2579_s16  }
 0x298   : > { %p2582_p2 = scmp.ne.s32.totalorder %s2580_s24, 0  ;;  %s1211_s30 = scalar_lea.sflag [#allocation4], %s1210_s19 }
 0x299   : > { %p2583_p4 = scmp.ge.s32.totalorder %s2581_s0, 2 }
 0x29b   : > { %p1685_p8 = pnand %p2583_p4, %p2582_p2 }
 0x29d   : > { %p1686_p11 = pneg %p1685_p8 }
 0x29f   : > { %2029 = dma.done.wait (%p1686_p11), %s1211_s30, 128  }
 0x2a0   : > { %2031 = vsyncadd (%p1686_p11), %s1211_s30, 4294967168  ;;  %s2584_s12 = sadd.s32 4294967294, %s2581_s0  }
 0x2a1   : > { %s1219_s8 = sand.u32 1, %s2584_s12  }
 0x2a2   : > { %s1220_s18 = scalar_lea.sflag [#allocation13], %s1219_s8 }
 0x2a3   : > { %2033 = dma.done.wait (%p1686_p11), %s1220_s18, 256  }
 0x2a4   : > { %2035 = vsyncadd (%p1686_p11), %s1220_s18, 4294967040  ;;  %s2585_s12 = sld [smem:[#allocation23_spill]]  ;;  %s2587_s30 = smov %s2042_s10 }
 0x2a5   : > { %s2586_s23 = sld [smem:[#allocation24_spill]]  ;;  %s2588_s10 = smov %s2046_s11 }
 0x2aa   : > { %p30_p0 = scmp.ge.s32.totalorder %s2585_s12, 4  }
 0x2ab   : > { %s2589_s11 = smov %s2586_s23 }
 0x2ac   :  { %32 = sbr.rel (!%p30_p0) target bundleno = 15 (0xf), region = 157 }
 0x2b1   :  { %1234 = vsyncpa [#allocation3], 1 }
 0x2b2   :  { %1236 = vsyncpa [#allocation3 + $0x1], 1 }
 0x2b3   :  { %1237 = vsyncpa [#allocation6], 1 }
 0x2b4   :  { %1239 = vsyncpa [#allocation6 + $0x1], 1 }
 0x2b5   :  { %1240 = vsyncpa [#allocation9], 1 }
 0x2b6   :  { %1241 = vsyncpa [#allocation4], 1 }
 0x2b7   :  { %1243 = vsyncpa [#allocation4 + $0x1], 1 }
 0x2b8   :  { %1244 = vsyncpa [#allocation13], 1 }
 0x2b9   :  { %1246 = vsyncpa [#allocation13 + $0x1], 1 }

</bundles_post_ra>
